<compile_context>
chip_gen: v7x
topology: tpu7x:2x2x1
jax: 0.10.0
libtpu: 0.0.40
codegen_flags: <defaults>
</compile_context>

<pallas_src>
import numpy as np
import jax
import jax.numpy as jnp
from jax.experimental import pallas as pl
from jax.experimental.pallas import tpu as pltpu

KSIZE = 5
PAD = 2

_SRM_BASE = np.array(
    [[[-1, 2, -2, 2, -1],
      [2, -6, 8, -6, 2],
      [-2, 8, -12, 8, -2],
      [2, -6, 8, -6, 2],
      [-1, 2, -2, 2, -1]],
     [[0, 0, 0, 0, 0],
      [0, -1, 2, -1, 0],
      [0, 2, -4, 2, 0],
      [0, -1, 2, -1, 0],
      [0, 0, 0, 0, 0]],
     [[0, 0, 1, 0, 0],
      [0, 2, -8, 2, 0],
      [1, -8, 20, -8, 1],
      [0, 2, -8, 2, 0],
      [0, 0, 1, 0, 0]]],
    dtype=np.float32) * 2.0
# Same normalization as the PyTorch module: k / sum(|k|) per kernel.
_SRM = _SRM_BASE / np.abs(_SRM_BASE).sum(axis=(1, 2), keepdims=True)  # (3,5,5)


def _srm_kernel(x_ref, o_ref):
    """x_ref: (H+4, W+4) padded input plane; o_ref: (3, H, W) output planes."""
    _, H, W = o_ref.shape
    accs = [jnp.zeros((H, W), jnp.float32) for _ in range(3)]
    for dy in range(KSIZE):
        for dx in range(KSIZE):
            taps = [float(_SRM[k, dy, dx]) for k in range(3)]
            if all(t == 0.0 for t in taps):
                continue
            # Static (possibly unaligned) VMEM window load, shared by all
            # three SRM kernels for this tap position.
            s = x_ref[dy:dy + H, dx:dx + W].astype(jnp.float32)
            for k in range(3):
                if taps[k] != 0.0:
                    accs[k] = accs[k] + taps[k] * s
    for k in range(3):
        o_ref[k] = accs[k].astype(o_ref.dtype)


def srm_filter(x):
    """SRMFilter.forward: x [N, 3, H, W] -> [N, 9, H, W]."""
    N, C, H, W = x.shape
    assert C == 3, "SRMFilter expects 3 input channels"
    # 'same' padding done once up front so the kernel only needs static window
    # loads (no boundary special-casing / unsupported in-kernel pad).
    xp = jnp.pad(x, ((0, 0), (0, 0), (PAD, PAD), (PAD, PAD)))
    Hp, Wp = H + 2 * PAD, W + 2 * PAD

    return pl.pallas_call(
        _srm_kernel,
        out_shape=jax.ShapeDtypeStruct((N, 3 * C, H, W), x.dtype),
        grid_spec=pltpu.PrefetchScalarGridSpec(
            num_scalar_prefetch=0,
            grid=(N, C),
            in_specs=[
                pl.BlockSpec((None, None, Hp, Wp), lambda b, c: (b, c, 0, 0)),
            ],
            out_specs=pl.BlockSpec((None, 3, H, W), lambda b, c: (b, c, 0, 0)),
        ),
        compiler_params=pltpu.CompilerParams(
            dimension_semantics=("parallel", "parallel")),
    )(xp)


def _full_conv_weights():
    """Build the dense 9x3x5x5 weight tensor exactly like the PyTorch module."""
    w = np.zeros((9, 3, KSIZE, KSIZE), dtype=np.float32)
    for i in range(3):
        for k in range(3):
            w[i * 3 + k, i] = _SRM[k]
    return jnp.asarray(w)


def srm_filter_ref(x):
    """Pure-JAX reference mirroring nn.Conv2d(3, 9, 5, padding=2, bias=False)."""
    return jax.lax.conv_general_dilated(
        x.astype(jnp.float32), _full_conv_weights(),
        window_strides=(1, 1), padding=((PAD, PAD), (PAD, PAD)),
        dimension_numbers=("NCHW", "OIHW", "NCHW"),
        precision=jax.lax.Precision.HIGHEST).astype(x.dtype)


if __name__ == "__main__":
    key = jax.random.PRNGKey(0)
    x = jax.random.normal(key, (2, 3, 16, 16), dtype=jnp.float32)

    out = srm_filter(x)
    jax.block_until_ready(out)

    ref = srm_filter_ref(x)
    assert out.shape == (2, 9, 16, 16), out.shape
    assert jnp.allclose(out, ref, rtol=1e-5, atol=1e-5), (
        float(jnp.max(jnp.abs(out - ref))))
    print("KERNEL_OK")
</pallas_src>

<mosaic_0001>
module attributes {stable_mosaic.version = 11 : i64} {
  func.func @_srm_kernel(%arg0: i32, %arg1: i32, %arg2: memref<1x1x20x20xf32, #tpu.memory_space<vmem>>, %arg3: memref<1x3x16x16xf32, #tpu.memory_space<vmem>>) attributes {dimension_semantics = [#tpu.dimension_semantics<parallel>, #tpu.dimension_semantics<parallel>], iteration_bounds = array<i64: 2, 3>, scalar_prefetch = 0 : i64, scratch_operands = 0 : i64, tpu.core_type = #tpu.core_type<tc>, window_params = [{transform_indices = @transform_0, window_bounds = array<i64: 1, 1, 20, 20>}, {transform_indices = @transform_1, window_bounds = array<i64: 1, 3, 16, 16>}]} {
    %cst = arith.constant 0.000000e+00 : f32
    %0 = vector.broadcast %cst : f32 to vector<16x16xf32>
    %cst_0 = arith.constant 0.000000e+00 : f32
    %1 = vector.broadcast %cst_0 : f32 to vector<16x16xf32>
    %cst_1 = arith.constant 0.000000e+00 : f32
    %2 = vector.broadcast %cst_1 : f32 to vector<16x16xf32>
    %c0 = arith.constant 0 : index
    %c0_2 = arith.constant 0 : index
    %c0_3 = arith.constant 0 : index
    %c0_4 = arith.constant 0 : index
    %3 = vector.load %arg2[%c0, %c0_2, %c0_3, %c0_4] : memref<1x1x20x20xf32, #tpu.memory_space<vmem>>, vector<1x1x16x16xf32>
    %4 = vector.shape_cast %3 : vector<1x1x16x16xf32> to vector<16x16xf32>
    %cst_5 = arith.constant -0.010416667 : f32
    %5 = vector.broadcast %cst_5 : f32 to vector<16x16xf32>
    %6 = arith.mulf %5, %4 : vector<16x16xf32>
    %7 = arith.addf %0, %6 : vector<16x16xf32>
    %c0_6 = arith.constant 0 : index
    %c0_7 = arith.constant 0 : index
    %c0_8 = arith.constant 0 : index
    %c1 = arith.constant 1 : index
    %8 = vector.load %arg2[%c0_6, %c0_7, %c0_8, %c1] : memref<1x1x20x20xf32, #tpu.memory_space<vmem>>, vector<1x1x16x16xf32>
    %9 = vector.shape_cast %8 : vector<1x1x16x16xf32> to vector<16x16xf32>
    %cst_9 = arith.constant 0.020833334 : f32
    %10 = vector.broadcast %cst_9 : f32 to vector<16x16xf32>
    %11 = arith.mulf %10, %9 : vector<16x16xf32>
    %12 = arith.addf %7, %11 : vector<16x16xf32>
    %c0_10 = arith.constant 0 : index
    %c0_11 = arith.constant 0 : index
    %c0_12 = arith.constant 0 : index
    %c2 = arith.constant 2 : index
    %13 = vector.load %arg2[%c0_10, %c0_11, %c0_12, %c2] : memref<1x1x20x20xf32, #tpu.memory_space<vmem>>, vector<1x1x16x16xf32>
    %14 = vector.shape_cast %13 : vector<1x1x16x16xf32> to vector<16x16xf32>
    %cst_13 = arith.constant -0.020833334 : f32
    %15 = vector.broadcast %cst_13 : f32 to vector<16x16xf32>
    %16 = arith.mulf %15, %14 : vector<16x16xf32>
    %17 = arith.addf %12, %16 : vector<16x16xf32>
    %cst_14 = arith.constant 1.562500e-02 : f32
    %18 = vector.broadcast %cst_14 : f32 to vector<16x16xf32>
    %19 = arith.mulf %18, %14 : vector<16x16xf32>
    %20 = arith.addf %2, %19 : vector<16x16xf32>
    %c0_15 = arith.constant 0 : index
    %c0_16 = arith.constant 0 : index
    %c0_17 = arith.constant 0 : index
    %c3 = arith.constant 3 : index
    %21 = vector.load %arg2[%c0_15, %c0_16, %c0_17, %c3] : memref<1x1x20x20xf32, #tpu.memory_space<vmem>>, vector<1x1x16x16xf32>
    %22 = vector.shape_cast %21 : vector<1x1x16x16xf32> to vector<16x16xf32>
    %cst_18 = arith.constant 0.020833334 : f32
    %23 = vector.broadcast %cst_18 : f32 to vector<16x16xf32>
    %24 = arith.mulf %23, %22 : vector<16x16xf32>
    %25 = arith.addf %17, %24 : vector<16x16xf32>
    %c0_19 = arith.constant 0 : index
    %c0_20 = arith.constant 0 : index
    %c0_21 = arith.constant 0 : index
    %c4 = arith.constant 4 : index
    %26 = vector.load %arg2[%c0_19, %c0_20, %c0_21, %c4] : memref<1x1x20x20xf32, #tpu.memory_space<vmem>>, vector<1x1x16x16xf32>
    %27 = vector.shape_cast %26 : vector<1x1x16x16xf32> to vector<16x16xf32>
    %cst_22 = arith.constant -0.010416667 : f32
    %28 = vector.broadcast %cst_22 : f32 to vector<16x16xf32>
    %29 = arith.mulf %28, %27 : vector<16x16xf32>
    %30 = arith.addf %25, %29 : vector<16x16xf32>
    %c0_23 = arith.constant 0 : index
    %c0_24 = arith.constant 0 : index
    %c1_25 = arith.constant 1 : index
    %c0_26 = arith.constant 0 : index
    %31 = vector.load %arg2[%c0_23, %c0_24, %c1_25, %c0_26] : memref<1x1x20x20xf32, #tpu.memory_space<vmem>>, vector<1x1x16x16xf32>
    %32 = vector.shape_cast %31 : vector<1x1x16x16xf32> to vector<16x16xf32>
    %cst_27 = arith.constant 0.020833334 : f32
    %33 = vector.broadcast %cst_27 : f32 to vector<16x16xf32>
    %34 = arith.mulf %33, %32 : vector<16x16xf32>
    %35 = arith.addf %30, %34 : vector<16x16xf32>
    %c0_28 = arith.constant 0 : index
    %c0_29 = arith.constant 0 : index
    %c1_30 = arith.constant 1 : index
    %c1_31 = arith.constant 1 : index
    %36 = vector.load %arg2[%c0_28, %c0_29, %c1_30, %c1_31] : memref<1x1x20x20xf32, #tpu.memory_space<vmem>>, vector<1x1x16x16xf32>
    %37 = vector.shape_cast %36 : vector<1x1x16x16xf32> to vector<16x16xf32>
    %cst_32 = arith.constant -6.250000e-02 : f32
    %38 = vector.broadcast %cst_32 : f32 to vector<16x16xf32>
    %39 = arith.mulf %38, %37 : vector<16x16xf32>
    %40 = arith.addf %35, %39 : vector<16x16xf32>
    %cst_33 = arith.constant -6.250000e-02 : f32
    %41 = vector.broadcast %cst_33 : f32 to vector<16x16xf32>
    %42 = arith.mulf %41, %37 : vector<16x16xf32>
    %43 = arith.addf %1, %42 : vector<16x16xf32>
    %cst_34 = arith.constant 3.125000e-02 : f32
    %44 = vector.broadcast %cst_34 : f32 to vector<16x16xf32>
    %45 = arith.mulf %44, %37 : vector<16x16xf32>
    %46 = arith.addf %20, %45 : vector<16x16xf32>
    %c0_35 = arith.constant 0 : index
    %c0_36 = arith.constant 0 : index
    %c1_37 = arith.constant 1 : index
    %c2_38 = arith.constant 2 : index
    %47 = vector.load %arg2[%c0_35, %c0_36, %c1_37, %c2_38] : memref<1x1x20x20xf32, #tpu.memory_space<vmem>>, vector<1x1x16x16xf32>
    %48 = vector.shape_cast %47 : vector<1x1x16x16xf32> to vector<16x16xf32>
    %cst_39 = arith.constant 0.0833333358 : f32
    %49 = vector.broadcast %cst_39 : f32 to vector<16x16xf32>
    %50 = arith.mulf %49, %48 : vector<16x16xf32>
    %51 = arith.addf %40, %50 : vector<16x16xf32>
    %cst_40 = arith.constant 1.250000e-01 : f32
    %52 = vector.broadcast %cst_40 : f32 to vector<16x16xf32>
    %53 = arith.mulf %52, %48 : vector<16x16xf32>
    %54 = arith.addf %43, %53 : vector<16x16xf32>
    %cst_41 = arith.constant -1.250000e-01 : f32
    %55 = vector.broadcast %cst_41 : f32 to vector<16x16xf32>
    %56 = arith.mulf %55, %48 : vector<16x16xf32>
    %57 = arith.addf %46, %56 : vector<16x16xf32>
    %c0_42 = arith.constant 0 : index
    %c0_43 = arith.constant 0 : index
    %c1_44 = arith.constant 1 : index
    %c3_45 = arith.constant 3 : index
    %58 = vector.load %arg2[%c0_42, %c0_43, %c1_44, %c3_45] : memref<1x1x20x20xf32, #tpu.memory_space<vmem>>, vector<1x1x16x16xf32>
    %59 = vector.shape_cast %58 : vector<1x1x16x16xf32> to vector<16x16xf32>
    %cst_46 = arith.constant -6.250000e-02 : f32
    %60 = vector.broadcast %cst_46 : f32 to vector<16x16xf32>
    %61 = arith.mulf %60, %59 : vector<16x16xf32>
    %62 = arith.addf %51, %61 : vector<16x16xf32>
    %cst_47 = arith.constant -6.250000e-02 : f32
    %63 = vector.broadcast %cst_47 : f32 to vector<16x16xf32>
    %64 = arith.mulf %63, %59 : vector<16x16xf32>
    %65 = arith.addf %54, %64 : vector<16x16xf32>
    %cst_48 = arith.constant 3.125000e-02 : f32
    %66 = vector.broadcast %cst_48 : f32 to vector<16x16xf32>
    %67 = arith.mulf %66, %59 : vector<16x16xf32>
    %68 = arith.addf %57, %67 : vector<16x16xf32>
    %c0_49 = arith.constant 0 : index
    %c0_50 = arith.constant 0 : index
    %c1_51 = arith.constant 1 : index
    %c4_52 = arith.constant 4 : index
    %69 = vector.load %arg2[%c0_49, %c0_50, %c1_51, %c4_52] : memref<1x1x20x20xf32, #tpu.memory_space<vmem>>, vector<1x1x16x16xf32>
    %70 = vector.shape_cast %69 : vector<1x1x16x16xf32> to vector<16x16xf32>
    %cst_53 = arith.constant 0.020833334 : f32
    %71 = vector.broadcast %cst_53 : f32 to vector<16x16xf32>
    %72 = arith.mulf %71, %70 : vector<16x16xf32>
    %73 = arith.addf %62, %72 : vector<16x16xf32>
    %c0_54 = arith.constant 0 : index
    %c0_55 = arith.constant 0 : index
    %c2_56 = arith.constant 2 : index
    %c0_57 = arith.constant 0 : index
    %74 = vector.load %arg2[%c0_54, %c0_55, %c2_56, %c0_57] : memref<1x1x20x20xf32, #tpu.memory_space<vmem>>, vector<1x1x16x16xf32>
    %75 = vector.shape_cast %74 : vector<1x1x16x16xf32> to vector<16x16xf32>
    %cst_58 = arith.constant -0.020833334 : f32
    %76 = vector.broadcast %cst_58 : f32 to vector<16x16xf32>
    %77 = arith.mulf %76, %75 : vector<16x16xf32>
    %78 = arith.addf %73, %77 : vector<16x16xf32>
    %cst_59 = arith.constant 1.562500e-02 : f32
    %79 = vector.broadcast %cst_59 : f32 to vector<16x16xf32>
    %80 = arith.mulf %79, %75 : vector<16x16xf32>
    %81 = arith.addf %68, %80 : vector<16x16xf32>
    %c0_60 = arith.constant 0 : index
    %c0_61 = arith.constant 0 : index
    %c2_62 = arith.constant 2 : index
    %c1_63 = arith.constant 1 : index
    %82 = vector.load %arg2[%c0_60, %c0_61, %c2_62, %c1_63] : memref<1x1x20x20xf32, #tpu.memory_space<vmem>>, vector<1x1x16x16xf32>
    %83 = vector.shape_cast %82 : vector<1x1x16x16xf32> to vector<16x16xf32>
    %cst_64 = arith.constant 0.0833333358 : f32
    %84 = vector.broadcast %cst_64 : f32 to vector<16x16xf32>
    %85 = arith.mulf %84, %83 : vector<16x16xf32>
    %86 = arith.addf %78, %85 : vector<16x16xf32>
    %cst_65 = arith.constant 1.250000e-01 : f32
    %87 = vector.broadcast %cst_65 : f32 to vector<16x16xf32>
    %88 = arith.mulf %87, %83 : vector<16x16xf32>
    %89 = arith.addf %65, %88 : vector<16x16xf32>
    %cst_66 = arith.constant -1.250000e-01 : f32
    %90 = vector.broadcast %cst_66 : f32 to vector<16x16xf32>
    %91 = arith.mulf %90, %83 : vector<16x16xf32>
    %92 = arith.addf %81, %91 : vector<16x16xf32>
    %c0_67 = arith.constant 0 : index
    %c0_68 = arith.constant 0 : index
    %c2_69 = arith.constant 2 : index
    %c2_70 = arith.constant 2 : index
    %93 = vector.load %arg2[%c0_67, %c0_68, %c2_69, %c2_70] : memref<1x1x20x20xf32, #tpu.memory_space<vmem>>, vector<1x1x16x16xf32>
    %94 = vector.shape_cast %93 : vector<1x1x16x16xf32> to vector<16x16xf32>
    %cst_71 = arith.constant -1.250000e-01 : f32
    %95 = vector.broadcast %cst_71 : f32 to vector<16x16xf32>
    %96 = arith.mulf %95, %94 : vector<16x16xf32>
    %97 = arith.addf %86, %96 : vector<16x16xf32>
    %cst_72 = arith.constant -2.500000e-01 : f32
    %98 = vector.broadcast %cst_72 : f32 to vector<16x16xf32>
    %99 = arith.mulf %98, %94 : vector<16x16xf32>
    %100 = arith.addf %89, %99 : vector<16x16xf32>
    %cst_73 = arith.constant 3.125000e-01 : f32
    %101 = vector.broadcast %cst_73 : f32 to vector<16x16xf32>
    %102 = arith.mulf %101, %94 : vector<16x16xf32>
    %103 = arith.addf %92, %102 : vector<16x16xf32>
    %c0_74 = arith.constant 0 : index
    %c0_75 = arith.constant 0 : index
    %c2_76 = arith.constant 2 : index
    %c3_77 = arith.constant 3 : index
    %104 = vector.load %arg2[%c0_74, %c0_75, %c2_76, %c3_77] : memref<1x1x20x20xf32, #tpu.memory_space<vmem>>, vector<1x1x16x16xf32>
    %105 = vector.shape_cast %104 : vector<1x1x16x16xf32> to vector<16x16xf32>
    %cst_78 = arith.constant 0.0833333358 : f32
    %106 = vector.broadcast %cst_78 : f32 to vector<16x16xf32>
    %107 = arith.mulf %106, %105 : vector<16x16xf32>
    %108 = arith.addf %97, %107 : vector<16x16xf32>
    %cst_79 = arith.constant 1.250000e-01 : f32
    %109 = vector.broadcast %cst_79 : f32 to vector<16x16xf32>
    %110 = arith.mulf %109, %105 : vector<16x16xf32>
    %111 = arith.addf %100, %110 : vector<16x16xf32>
    %cst_80 = arith.constant -1.250000e-01 : f32
    %112 = vector.broadcast %cst_80 : f32 to vector<16x16xf32>
    %113 = arith.mulf %112, %105 : vector<16x16xf32>
    %114 = arith.addf %103, %113 : vector<16x16xf32>
    %c0_81 = arith.constant 0 : index
    %c0_82 = arith.constant 0 : index
    %c2_83 = arith.constant 2 : index
    %c4_84 = arith.constant 4 : index
    %115 = vector.load %arg2[%c0_81, %c0_82, %c2_83, %c4_84] : memref<1x1x20x20xf32, #tpu.memory_space<vmem>>, vector<1x1x16x16xf32>
    %116 = vector.shape_cast %115 : vector<1x1x16x16xf32> to vector<16x16xf32>
    %cst_85 = arith.constant -0.020833334 : f32
    %117 = vector.broadcast %cst_85 : f32 to vector<16x16xf32>
    %118 = arith.mulf %117, %116 : vector<16x16xf32>
    %119 = arith.addf %108, %118 : vector<16x16xf32>
    %cst_86 = arith.constant 1.562500e-02 : f32
    %120 = vector.broadcast %cst_86 : f32 to vector<16x16xf32>
    %121 = arith.mulf %120, %116 : vector<16x16xf32>
    %122 = arith.addf %114, %121 : vector<16x16xf32>
    %c0_87 = arith.constant 0 : index
    %c0_88 = arith.constant 0 : index
    %c3_89 = arith.constant 3 : index
    %c0_90 = arith.constant 0 : index
    %123 = vector.load %arg2[%c0_87, %c0_88, %c3_89, %c0_90] : memref<1x1x20x20xf32, #tpu.memory_space<vmem>>, vector<1x1x16x16xf32>
    %124 = vector.shape_cast %123 : vector<1x1x16x16xf32> to vector<16x16xf32>
    %cst_91 = arith.constant 0.020833334 : f32
    %125 = vector.broadcast %cst_91 : f32 to vector<16x16xf32>
    %126 = arith.mulf %125, %124 : vector<16x16xf32>
    %127 = arith.addf %119, %126 : vector<16x16xf32>
    %c0_92 = arith.constant 0 : index
    %c0_93 = arith.constant 0 : index
    %c3_94 = arith.constant 3 : index
    %c1_95 = arith.constant 1 : index
    %128 = vector.load %arg2[%c0_92, %c0_93, %c3_94, %c1_95] : memref<1x1x20x20xf32, #tpu.memory_space<vmem>>, vector<1x1x16x16xf32>
    %129 = vector.shape_cast %128 : vector<1x1x16x16xf32> to vector<16x16xf32>
    %cst_96 = arith.constant -6.250000e-02 : f32
    %130 = vector.broadcast %cst_96 : f32 to vector<16x16xf32>
    %131 = arith.mulf %130, %129 : vector<16x16xf32>
    %132 = arith.addf %127, %131 : vector<16x16xf32>
    %cst_97 = arith.constant -6.250000e-02 : f32
    %133 = vector.broadcast %cst_97 : f32 to vector<16x16xf32>
    %134 = arith.mulf %133, %129 : vector<16x16xf32>
    %135 = arith.addf %111, %134 : vector<16x16xf32>
    %cst_98 = arith.constant 3.125000e-02 : f32
    %136 = vector.broadcast %cst_98 : f32 to vector<16x16xf32>
    %137 = arith.mulf %136, %129 : vector<16x16xf32>
    %138 = arith.addf %122, %137 : vector<16x16xf32>
    %c0_99 = arith.constant 0 : index
    %c0_100 = arith.constant 0 : index
    %c3_101 = arith.constant 3 : index
    %c2_102 = arith.constant 2 : index
    %139 = vector.load %arg2[%c0_99, %c0_100, %c3_101, %c2_102] : memref<1x1x20x20xf32, #tpu.memory_space<vmem>>, vector<1x1x16x16xf32>
    %140 = vector.shape_cast %139 : vector<1x1x16x16xf32> to vector<16x16xf32>
    %cst_103 = arith.constant 0.0833333358 : f32
    %141 = vector.broadcast %cst_103 : f32 to vector<16x16xf32>
    %142 = arith.mulf %141, %140 : vector<16x16xf32>
    %143 = arith.addf %132, %142 : vector<16x16xf32>
    %cst_104 = arith.constant 1.250000e-01 : f32
    %144 = vector.broadcast %cst_104 : f32 to vector<16x16xf32>
    %145 = arith.mulf %144, %140 : vector<16x16xf32>
    %146 = arith.addf %135, %145 : vector<16x16xf32>
    %cst_105 = arith.constant -1.250000e-01 : f32
    %147 = vector.broadcast %cst_105 : f32 to vector<16x16xf32>
    %148 = arith.mulf %147, %140 : vector<16x16xf32>
    %149 = arith.addf %138, %148 : vector<16x16xf32>
    %c0_106 = arith.constant 0 : index
    %c0_107 = arith.constant 0 : index
    %c3_108 = arith.constant 3 : index
    %c3_109 = arith.constant 3 : index
    %150 = vector.load %arg2[%c0_106, %c0_107, %c3_108, %c3_109] : memref<1x1x20x20xf32, #tpu.memory_space<vmem>>, vector<1x1x16x16xf32>
    %151 = vector.shape_cast %150 : vector<1x1x16x16xf32> to vector<16x16xf32>
    %cst_110 = arith.constant -6.250000e-02 : f32
    %152 = vector.broadcast %cst_110 : f32 to vector<16x16xf32>
    %153 = arith.mulf %152, %151 : vector<16x16xf32>
    %154 = arith.addf %143, %153 : vector<16x16xf32>
    %cst_111 = arith.constant -6.250000e-02 : f32
    %155 = vector.broadcast %cst_111 : f32 to vector<16x16xf32>
    %156 = arith.mulf %155, %151 : vector<16x16xf32>
    %157 = arith.addf %146, %156 : vector<16x16xf32>
    %cst_112 = arith.constant 3.125000e-02 : f32
    %158 = vector.broadcast %cst_112 : f32 to vector<16x16xf32>
    %159 = arith.mulf %158, %151 : vector<16x16xf32>
    %160 = arith.addf %149, %159 : vector<16x16xf32>
    %c0_113 = arith.constant 0 : index
    %c0_114 = arith.constant 0 : index
    %c3_115 = arith.constant 3 : index
    %c4_116 = arith.constant 4 : index
    %161 = vector.load %arg2[%c0_113, %c0_114, %c3_115, %c4_116] : memref<1x1x20x20xf32, #tpu.memory_space<vmem>>, vector<1x1x16x16xf32>
    %162 = vector.shape_cast %161 : vector<1x1x16x16xf32> to vector<16x16xf32>
    %cst_117 = arith.constant 0.020833334 : f32
    %163 = vector.broadcast %cst_117 : f32 to vector<16x16xf32>
    %164 = arith.mulf %163, %162 : vector<16x16xf32>
    %165 = arith.addf %154, %164 : vector<16x16xf32>
    %c0_118 = arith.constant 0 : index
    %c0_119 = arith.constant 0 : index
    %c4_120 = arith.constant 4 : index
    %c0_121 = arith.constant 0 : index
    %166 = vector.load %arg2[%c0_118, %c0_119, %c4_120, %c0_121] : memref<1x1x20x20xf32, #tpu.memory_space<vmem>>, vector<1x1x16x16xf32>
    %167 = vector.shape_cast %166 : vector<1x1x16x16xf32> to vector<16x16xf32>
    %cst_122 = arith.constant -0.010416667 : f32
    %168 = vector.broadcast %cst_122 : f32 to vector<16x16xf32>
    %169 = arith.mulf %168, %167 : vector<16x16xf32>
    %170 = arith.addf %165, %169 : vector<16x16xf32>
    %c0_123 = arith.constant 0 : index
    %c0_124 = arith.constant 0 : index
    %c4_125 = arith.constant 4 : index
    %c1_126 = arith.constant 1 : index
    %171 = vector.load %arg2[%c0_123, %c0_124, %c4_125, %c1_126] : memref<1x1x20x20xf32, #tpu.memory_space<vmem>>, vector<1x1x16x16xf32>
    %172 = vector.shape_cast %171 : vector<1x1x16x16xf32> to vector<16x16xf32>
    %cst_127 = arith.constant 0.020833334 : f32
    %173 = vector.broadcast %cst_127 : f32 to vector<16x16xf32>
    %174 = arith.mulf %173, %172 : vector<16x16xf32>
    %175 = arith.addf %170, %174 : vector<16x16xf32>
    %c0_128 = arith.constant 0 : index
    %c0_129 = arith.constant 0 : index
    %c4_130 = arith.constant 4 : index
    %c2_131 = arith.constant 2 : index
    %176 = vector.load %arg2[%c0_128, %c0_129, %c4_130, %c2_131] : memref<1x1x20x20xf32, #tpu.memory_space<vmem>>, vector<1x1x16x16xf32>
    %177 = vector.shape_cast %176 : vector<1x1x16x16xf32> to vector<16x16xf32>
    %cst_132 = arith.constant -0.020833334 : f32
    %178 = vector.broadcast %cst_132 : f32 to vector<16x16xf32>
    %179 = arith.mulf %178, %177 : vector<16x16xf32>
    %180 = arith.addf %175, %179 : vector<16x16xf32>
    %cst_133 = arith.constant 1.562500e-02 : f32
    %181 = vector.broadcast %cst_133 : f32 to vector<16x16xf32>
    %182 = arith.mulf %181, %177 : vector<16x16xf32>
    %183 = arith.addf %160, %182 : vector<16x16xf32>
    %c0_134 = arith.constant 0 : index
    %c0_135 = arith.constant 0 : index
    %c4_136 = arith.constant 4 : index
    %c3_137 = arith.constant 3 : index
    %184 = vector.load %arg2[%c0_134, %c0_135, %c4_136, %c3_137] : memref<1x1x20x20xf32, #tpu.memory_space<vmem>>, vector<1x1x16x16xf32>
    %185 = vector.shape_cast %184 : vector<1x1x16x16xf32> to vector<16x16xf32>
    %cst_138 = arith.constant 0.020833334 : f32
    %186 = vector.broadcast %cst_138 : f32 to vector<16x16xf32>
    %187 = arith.mulf %186, %185 : vector<16x16xf32>
    %188 = arith.addf %180, %187 : vector<16x16xf32>
    %c0_139 = arith.constant 0 : index
    %c0_140 = arith.constant 0 : index
    %c4_141 = arith.constant 4 : index
    %c4_142 = arith.constant 4 : index
    %189 = vector.load %arg2[%c0_139, %c0_140, %c4_141, %c4_142] : memref<1x1x20x20xf32, #tpu.memory_space<vmem>>, vector<1x1x16x16xf32>
    %190 = vector.shape_cast %189 : vector<1x1x16x16xf32> to vector<16x16xf32>
    %cst_143 = arith.constant -0.010416667 : f32
    %191 = vector.broadcast %cst_143 : f32 to vector<16x16xf32>
    %192 = arith.mulf %191, %190 : vector<16x16xf32>
    %193 = arith.addf %188, %192 : vector<16x16xf32>
    %c0_144 = arith.constant 0 : index
    %c0_145 = arith.constant 0 : index
    %c0_146 = arith.constant 0 : index
    %c0_147 = arith.constant 0 : index
    %194 = vector.load %arg3[%c0_144, %c0_145, %c0_146, %c0_147] : memref<1x3x16x16xf32, #tpu.memory_space<vmem>>, vector<1x1x16x16xf32>
    %195 = vector.shape_cast %194 : vector<1x1x16x16xf32> to vector<16x16xf32>
    %196 = vector.shape_cast %193 : vector<16x16xf32> to vector<1x1x16x16xf32>
    tpu.vector_store %arg3[%c0_144, %c0_145, %c0_146, %c0_147], %196 {strides = array<i32>} : memref<1x3x16x16xf32, #tpu.memory_space<vmem>>, vector<1x1x16x16xf32>,
    %c0_148 = arith.constant 0 : index
    %c1_149 = arith.constant 1 : index
    %c0_150 = arith.constant 0 : index
    %c0_151 = arith.constant 0 : index
    %197 = vector.load %arg3[%c0_148, %c1_149, %c0_150, %c0_151] : memref<1x3x16x16xf32, #tpu.memory_space<vmem>>, vector<1x1x16x16xf32>
    %198 = vector.shape_cast %197 : vector<1x1x16x16xf32> to vector<16x16xf32>
    %199 = vector.shape_cast %157 : vector<16x16xf32> to vector<1x1x16x16xf32>
    tpu.vector_store %arg3[%c0_148, %c1_149, %c0_150, %c0_151], %199 {strides = array<i32>} : memref<1x3x16x16xf32, #tpu.memory_space<vmem>>, vector<1x1x16x16xf32>,
    %c0_152 = arith.constant 0 : index
    %c2_153 = arith.constant 2 : index
    %c0_154 = arith.constant 0 : index
    %c0_155 = arith.constant 0 : index
    %200 = vector.load %arg3[%c0_152, %c2_153, %c0_154, %c0_155] : memref<1x3x16x16xf32, #tpu.memory_space<vmem>>, vector<1x1x16x16xf32>
    %201 = vector.shape_cast %200 : vector<1x1x16x16xf32> to vector<16x16xf32>
    %202 = vector.shape_cast %183 : vector<16x16xf32> to vector<1x1x16x16xf32>
    tpu.vector_store %arg3[%c0_152, %c2_153, %c0_154, %c0_155], %202 {strides = array<i32>} : memref<1x3x16x16xf32, #tpu.memory_space<vmem>>, vector<1x1x16x16xf32>,
    return
  }
  func.func @transform_0(%arg0: i32, %arg1: i32) -> (i32, i32, i32, i32) {
    %c0_i32 = arith.constant 0 : i32
    %c0_i32_0 = arith.constant 0 : i32
    %c0_i32_1 = arith.constant 0 : i32
    return %arg0, %arg1, %c0_i32, %c0_i32_0 : i32, i32, i32, i32
  }
  func.func @transform_1(%arg0: i32, %arg1: i32) -> (i32, i32, i32, i32) {
    %c0_i32 = arith.constant 0 : i32
    %c0_i32_0 = arith.constant 0 : i32
    %c0_i32_1 = arith.constant 0 : i32
    return %arg0, %arg1, %c0_i32, %c0_i32_0 : i32, i32, i32, i32
  }
}

</mosaic_0001>

<bundles_post_ra>
// kernel: tpu_custom_call.1
= control target key start
LH: loop header
LB: loop body
LE: loop exit
PB: predicated region body
PF: predicated region fallthrough
CT: control target
= control target key end

     0   :  { %6 = vsyncpa [#allocation3], 0  ;;  %s1280_s0 = inlined_call_operand.vmem [shape: f32[2,3,20,20], index: 0, kind: input, shape index: {}]   ;;  %s1281_s1 = inlined_call_operand.hbm [shape: f32[2,9,16,16], index: 1, kind: output, shape index: {}]  }
   0x1   :  { %8 = vsyncpa [#allocation3 + $0x1], 0  ;;  %s890_s6 = smov 0   ;;  %s892_s7 = smov 0  }
   0x2   :  { %s894_s8 = smov 0   ;;  %s896_s9 = smov 0  }
   0x3   :  { %s898_s10 = smov 0   ;;  %s900_s11 = smov 0  }
   0x4   :  { %s902_s12 = smov 0   ;;  %s904_s13 = smov 0  }
   0x5 LB: > { %s677_s14 = sadd.s32 4294967295, %s869_s13   ;;  %s678_s15 = sadd.s32 4294967294, %s869_s13   ;;  %s869_s13 = sphi %s904_s13, %s14_s13   ;;  %s865_s12 = sphi %s902_s12, %s1290_s12   ;;  %s861_s11 = sphi %s900_s11, %s1289_s11   ;;  %s857_s10 = sphi %s898_s10, %s1288_s10   ;;  %s853_s9 = sphi %s896_s9, %s1287_s9   ;;  %s849_s8 = sphi %s894_s8, %s1286_s8   ;;  %s845_s7 = sphi %s892_s7, %s1285_s7   ;;  %s841_s6 = sphi %s890_s6, %s1284_s6  }
   0x6   : > { %s23_s16 = sadd.s32 1, %s861_s11  ;;  %s26_s17 = sadd.s32 1, %s865_s12 }
   0x7   : > { %p24_p0 = scmp.ge.s32.totalorder %s23_s16, 3  ;;  %p73_p1 = scmp.ne.s32.totalorder %s849_s8, %s845_s7 }
   0x8   : > { %p74_p2 = scmp.eq.s32.totalorder %s677_s14, 5  ;;  %p79_p5 = scmp.ne.s32.totalorder %s845_s7, %s841_s6 }
   0x9   : > { %s1292_s16 = smov (%p24_p0, %s23_s16), 0  ;;  %s1294_s17 = smov (!%p24_p0, %s26_s17), %s865_s12 }
   0xa   : > { %s59_s18 = ssub.s32 %s861_s11, %s1292_s16  ;;  %p941_p3 = por %p74_p2, %p73_p1 }
   0xb   : > { %p28_p4 = scmp.ge.s32.totalorder %s1294_s17, 2  ;;  %p80_p6 = scmp.eq.s32.totalorder %s678_s15, 5 }
   0xc   : > { %p681_p7 = scmp.ge.s32.totalorder %s869_s13, 1  ;;  %p110_p9 = scmp.lt.s32.totalorder %s869_s13, 7 }
   0xd   : > { %s1296_s17 = smov (%p28_p4, %s1294_s17), 0  ;;  %p950_p8 = por %p80_p6, %p79_p5 }
   0xe   : > { %s58_s21 = ssub.s32 %s865_s12, %s1296_s17  ;;  %s63_s22 = sadd.s32 1, %s849_s8 }
   0xf   : > { %s60_s23 = sor.u32 %s59_s18, %s58_s21  ;;  %p111_p10 = pnand %p681_p7, %p110_p9 }
  0x10   : > { %p61_p11 = scmp.eq.s32.totalorder %s60_s23, 0  ;;  %p134_p12 = scmp.lt.s32.totalorder (!%p111_p10), %s857_s10, 1  ;;  %vm550_vm0 = vcmask (!%p111_p10), 130048  }
  0x11   : > { %114 = sbr.rel (%p111_p10) target bundleno = 343 (0x157), region = 24  ;;  %p136_p13 = scmp.lt.s32.totalorder (!%p111_p10), %s853_s9, 2 }
  0x12   : > { %s959_s24 = scalar_select %p61_p11, %s849_s8, %s63_s22  }
  0x13   : > { %s871_s5 = smov (!%p111_p10), 1   ;;  %s872_s14 = smov (!%p111_p10), 127  }
  0x14   : > { %s873_s15 = smov (!%p111_p10), 2   ;;  %s874_s18 = smov (!%p111_p10), 126  }
  0x15   : > { %s875_s21 = smov (!%p111_p10), 125   ;;  %s876_s22 = smov (!%p111_p10), 124  }
  0x16   : > { %s131_s23 = sand.u32 (!%p111_p10), 1, %s845_s7  }
  0x18   : > { %s135_s25 = scalar_select %p134_p12, %s857_s10, 1 }
  0x19   : > { %s137_s26 = scalar_select %p136_p13, %s853_s9, 2 }
  0x1a   : > { %s694_s27 = smul.u32 9, %s135_s25 }
  0x1b   : > { %s693_s28 = smul.u32 3, %s137_s26 }
  0x1c   : > { %s692_s25 = smul.u32 48, %s131_s23 }
  0x1d   : > { %s140_s29 = sadd.s32 %s694_s27, %s693_s28  ;;  %s691_s27 = smul.u32 6, %s853_s9 }
  0x1e   : > { %s682_s30 = sshll.u32 %s140_s29, 3  ;;  %s133_s26 = scalar_lea.vmem [#allocation2], %s692_s25 }
  0x1f   : > { %s968_s4 = scalar_lea.vmem %s1280_s0, %s682_s30  ;;  %s695_s28 = smul.u32 18, %s857_s10 }
  0x20   : > { %v971_v0 = vld [vmem:[%s968_s4 + $0x1] sm:$0xff]  ;;  %v977_v2 = vld [vmem:[%s968_s4 + $0x9] sm:$0xff]  ;;  %s592_s30 = sshll.u32 %s133_s26, 4  ;;  %s1228_s9 = scalar_lea.sflag [#allocation3], %s131_s23  ;;  %s1222_s30 = int_to_ptr.vmem [resolvable:$true] %s592_s30 }
  0x21   : > { %v974_v1 = vld [vmem:[%s968_s4] sm:$0xff]  ;;  %v216_v3 = vmul.f32 0.03125, %v971_v0  ;;  %v984_v5 = vld [vmem:[%s968_s4 + $0x8] sm:$0xff]  ;;  %v217_v6 = vmul.f32 0.03125, %v977_v2  ;;  %v241_v12 = vmul.f32 0.125, %v977_v2  ;;  %v240_v13 = vmul.f32 0.125, %v971_v0  ;;  %s589_s29 = sadd.s32 %s695_s28, %s691_s27 }
  0x22   : > { %v981_v4 = vmul.f32 0.020833334, %v974_v1  ;;  %v151_v7 = vmul.f32 0.020833334, %v984_v5  ;;  %v994_v8 = vld [vmem:[%s968_s4 + $0xa] sm:$0xff]  ;;  %v997_v9 = vld [vmem:[%s968_s4 + $0x2] sm:$0xff] }
  0x23   : > { %220 = vrot.lane.b32.xlu1 %v216_v3, %s871_s5  ;;  %v297_v10 = vmul.f32 0.015625, %v994_v8  ;;  %v296_v11 = vmul.f32 0.015625, %v997_v9  ;;  %v1008_v14 = vmul.f32 -0.125, %v994_v8  ;;  %v1011_v15 = vmul.f32 -0.125, %v997_v9  ;;  %v1044_v22 = vld [vmem:[%s968_s4 + $0xb] sm:$0xff]  ;;  %v1047_v23 = vld [vmem:[%s968_s4 + $0x3] sm:$0xff] }
  0x24   : > { %154 = vrot.lane.b32.xlu0 %v981_v4, %s872_s14  ;;  %v1018_v16 = vmul.f32 -0.0625, %v977_v2  ;;  %v1021_v17 = vmul.f32 -0.0625, %v971_v0  ;;  %v345_v18 = vmul.f32 -0.25, %v994_v8  ;;  %v344_v19 = vmul.f32 -0.25, %v997_v9  ;;  %v1146_v47 = vld [vmem:[%s968_s4 + $0xc] sm:$0xff]  ;;  %v1149_v48 = vld [vmem:[%s968_s4 + $0x4] sm:$0xff] }
  0x25   : > { %v1038_v20 = vmul.f32 0.125, %v994_v8  ;;  %v1041_v21 = vmul.f32 0.125, %v997_v9  ;;  %v425_v24 = vmul.f32 0.03125, %v1044_v22  ;;  %v424_v25 = vmul.f32 0.03125, %v1047_v23  ;;  %s688_s2 = sshll.u32 %s589_s29, 7  ;;  %s775_s10 = scalar_lea.vmem %s1222_s30, 768 }
  0x26   : > { %v449_v26 = vmul.f32 0.125, %v1044_v22  ;;  %v448_v27 = vmul.f32 0.125, %v1047_v23  ;;  %v1064_v28 = vmul.f32 -0.0625, %v1044_v22  ;;  %v1067_v29 = vmul.f32 -0.0625, %v1047_v23  ;;  %p776_p0 = scmp.ne.s32.totalorder %s1222_s30, %s775_s10 }
  0x27   : > { %222 = vrot.lane.b32.xlu1 %v217_v6, %s871_s5  ;;  %v163_v30 = vmul.f32 -0.020833334, %v984_v5  ;;  %v162_v31 = vmul.f32 -0.020833334, %v974_v1  ;;  %v147_v32 = vmul.f32 -0.010416667, %v984_v5 }
  0x28   : > { %156 = vrot.lane.b32.xlu0 %v151_v7, %s872_s14  ;;  %v146_v33 = vmul.f32 -0.010416667, %v974_v1  ;;  %v229_v34 = vmul.f32 0.083333336, %v977_v2  ;;  %v228_v35 = vmul.f32 0.083333336, %v971_v0  ;;  %p777_p1 = pnand %p776_p0, %p941_p3 }
  0x29   : > { %v1097_v36 = vmul.f32 0.020833334, %v977_v2  ;;  %v1100_v37 = vmul.f32 0.020833334, %v971_v0  ;;  %v309_v38 = vmul.f32 0.083333336, %v994_v8 }
  0x2a   : > { %v308_v39 = vmul.f32 0.083333336, %v997_v9  ;;  %v1117_v40 = vmul.f32 -0.020833334, %v994_v8  ;;  %v1120_v41 = vmul.f32 -0.020833334, %v997_v9  ;;  %p778_p2 = pneg %p777_p1 }
  0x2b   : > { %274 = vrot.lane.b32.xlu1 %v217_v6, %s872_s14  ;;  %v437_v42 = vmul.f32 0.083333336, %v1044_v22  ;;  %v436_v43 = vmul.f32 0.083333336, %v1047_v23  ;;  %v174_v44 = vmul.f32 0.015625, %v974_v1  ;;  %v252_v49 = vmul.f32 -0.125, %v971_v0 }
  0x2c   : > { %272 = vrot.lane.b32.xlu0 %v216_v3, %s872_s14  ;;  %v1140_v45 = vmul.f32 0.020833334, %v1044_v22  ;;  %v1143_v46 = vmul.f32 0.020833334, %v1047_v23  ;;  %v175_v54 = vmul.f32 0.015625, %v984_v5  ;;  %v253_v57 = vmul.f32 -0.125, %v977_v2 }
  0x2d   : > { %v505_v55 = vmul.f32 0.020833334, %v1146_v47  ;;  %v504_v56 = vmul.f32 0.020833334, %v1149_v48  ;;  %v517_v63 = vmul.f32 -0.020833334, %v1146_v47 }
  0x2e   : > { %v516_v0 = vmul.f32 -0.020833334, %v1149_v48  ;;  %v1173_v6 = vmul.f32 -0.010416667, %v1146_v47 }
  0x2f   : > { %302 = vrot.lane.b32.xlu1 %v297_v10, %s873_s15 }
  0x30   : > { %300 = vrot.lane.b32.xlu0 %v296_v11, %s873_s15 }
  0x33   : > { %246 = vrot.lane.b32.xlu1 %v241_v12, %s872_s14 }
  0x34   : > { %244 = vrot.lane.b32.xlu0 %v240_v13, %s872_s14 }
  0x37   : > { %330 = vrot.lane.b32.xlu1 %v1008_v14, %s871_s5 }
  0x38   : > { %328 = vrot.lane.b32.xlu0 %v1011_v15, %s871_s5 }
  0x3b   : > { %266 = vrot.lane.b32.xlu1 %v1018_v16, %s874_s18 }
  0x3c   : > { %264 = vrot.lane.b32.xlu0 %v1021_v17, %s874_s18 }
  0x3f   : > { %380 = vrot.lane.b32.xlu1 %v1008_v14, %s872_s14 }
  0x40   : > { %378 = vrot.lane.b32.xlu0 %v1011_v15, %s872_s14 }
  0x43   : > { %350 = vrot.lane.b32.xlu1 %v345_v18, %s872_s14  ;;  %v357_v18 = vmul.f32 0.3125, %v994_v8 }
  0x44   : > { %348 = vrot.lane.b32.xlu0 %v344_v19, %s872_s14  ;;  %v356_v19 = vmul.f32 0.3125, %v997_v9 }
  0x47   : > { %398 = vrot.lane.b32.xlu1 %v297_v10, %s874_s18 }
  0x48   : > { %396 = vrot.lane.b32.xlu0 %v296_v11, %s874_s18 }
  0x4b   : > { %372 = vrot.lane.b32.xlu1 %v1038_v20, %s874_s18 }
  0x4c   : > { %370 = vrot.lane.b32.xlu0 %v1041_v21, %s874_s18 }
  0x4f   : > { %430 = vrot.lane.b32.xlu1 %v425_v24, %s871_s5 }
  0x50   : > { %428 = vrot.lane.b32.xlu0 %v424_v25, %s871_s5  ;;  %s1220_s5 = scalar_lea.hbm %s1281_s1, %s688_s2 }
  0x53   : > { %454 = vrot.lane.b32.xlu1 %v449_v26, %s872_s14 }
  0x54   : > { %452 = vrot.lane.b32.xlu0 %v448_v27, %s872_s14 }
  0x57   : > { %482 = vrot.lane.b32.xlu1 %v425_v24, %s872_s14 }
  0x58   : > { %480 = vrot.lane.b32.xlu0 %v424_v25, %s872_s14 }
  0x5b   : > { %474 = vrot.lane.b32.xlu1 %v1064_v28, %s874_s18 }
  0x5c   : > { %472 = vrot.lane.b32.xlu0 %v1067_v29, %s874_s18 }
  0x5f   : > { %168 = vrot.lane.b32.xlu1 %v163_v30, %s874_s18 }
  0x60   : > { %166 = vrot.lane.b32.xlu0 %v162_v31, %s874_s18 }
  0x63   : > { %180 = vrot.lane.b32.xlu1 %v151_v7, %s875_s21  ;;  %v1176_v7 = vmul.f32 -0.010416667, %v1149_v48 }
  0x64   : > { %178 = vrot.lane.b32.xlu0 %v981_v4, %s875_s21 }
  0x67   : > { %190 = vrot.lane.b32.xlu1 %v147_v32, %s876_s22 }
  0x68   : > { %188 = vrot.lane.b32.xlu0 %v146_v33, %s876_s22 }
  0x6b   : > { %208 = vrot.lane.b32.xlu1 %v1018_v16, %s872_s14 }
  0x6c   : > { %206 = vrot.lane.b32.xlu0 %v1021_v17, %s872_s14 }
  0x6f   : > { %234 = vrot.lane.b32.xlu1 %v229_v34, %s874_s18 }
  0x70   : > { %232 = vrot.lane.b32.xlu0 %v228_v35, %s874_s18 }
  0x73   : > { %258 = vrot.lane.b32.xlu1 %v1018_v16, %s875_s21 }
  0x74   : > { %256 = vrot.lane.b32.xlu0 %v1021_v17, %s875_s21 }
  0x77   : > { %284 = vrot.lane.b32.xlu1 %v1097_v36, %s876_s22 }
  0x78   : > { %282 = vrot.lane.b32.xlu0 %v1100_v37, %s876_s22 }
  0x7b   : > { %314 = vrot.lane.b32.xlu1 %v309_v38, %s872_s14 }
  0x7c   : > { %312 = vrot.lane.b32.xlu0 %v308_v39, %s872_s14 }
  0x7f   : > { %338 = vrot.lane.b32.xlu1 %v1008_v14, %s874_s18 }
  0x80   : > { %336 = vrot.lane.b32.xlu0 %v1011_v15, %s874_s18 }
  0x83   : > { %362 = vrot.lane.b32.xlu1 %v309_v38, %s875_s21 }
  0x84   : > { %360 = vrot.lane.b32.xlu0 %v308_v39, %s875_s21 }
  0x87   : > { %390 = vrot.lane.b32.xlu1 %v1117_v40, %s876_s22 }
  0x88   : > { %388 = vrot.lane.b32.xlu0 %v1120_v41, %s876_s22 }
  0x8b   : > { %416 = vrot.lane.b32.xlu1 %v1064_v28, %s872_s14 }
  0x8c   : > { %414 = vrot.lane.b32.xlu0 %v1067_v29, %s872_s14 }
  0x8f   : > { %442 = vrot.lane.b32.xlu1 %v437_v42, %s874_s18 }
  0x90   : > { %440 = vrot.lane.b32.xlu0 %v436_v43, %s874_s18 }
  0x93   : > { %466 = vrot.lane.b32.xlu1 %v1064_v28, %s875_s21 }
  0x94   : > { %464 = vrot.lane.b32.xlu0 %v1067_v29, %s875_s21 }
  0x95   : > { %v221_v50 = vpop.permute.xlu1 %220 }
  0x96   : > { %v155_v51 = vpop.permute.xlu0 %154  ;;  %v226_v52 = vadd.f32 %v221_v50, %v174_v44 }
  0x97   : > { %v1152_v53 = vadd.f32 %v155_v51, %v146_v33  ;;  %492 = vrot.lane.b32.xlu1 %v1140_v45, %s876_s22 }
  0x98   : > { %490 = vrot.lane.b32.xlu0 %v1143_v46, %s876_s22  ;;  %v254_v58 = vadd.f32 %v252_v49, %v226_v52 }
  0x99   : > { %v223_v59 = vpop.permute.xlu1 %222 }
  0x9a   : > { %v157_v60 = vpop.permute.xlu0 %156  ;;  %v227_v61 = vadd.f32 %v223_v59, %v175_v54 }
  0x9b   : > { %v1162_v62 = vadd.f32 %v157_v60, %v147_v32  ;;  %510 = vrot.lane.b32.xlu1 %v505_v55, %s872_s14 }
  0x9c   : > { %508 = vrot.lane.b32.xlu0 %v504_v56, %s872_s14  ;;  %v255_v1 = vadd.f32 %v253_v57, %v227_v61  ;;  %v461_v57 = vmul.f32 -0.125, %v1044_v22  ;;  %v529_v22 = vmul.f32 0.015625, %v1146_v47 }
  0x9d   : > { %v275_v3 = vpop.permute.xlu1 %274 }
  0x9e   : > { %v273_v4 = vpop.permute.xlu0 %272  ;;  %v279_v12 = vadd.f32 %v275_v3, %v255_v1 }
  0x9f   : > { %522 = vrot.lane.b32.xlu1 %v517_v63, %s874_s18  ;;  %v278_v13 = vadd.f32 %v273_v4, %v254_v58  ;;  %v460_v58 = vmul.f32 -0.125, %v1047_v23  ;;  %v528_v23 = vmul.f32 0.015625, %v1149_v48 }
  0xa0   : > { %520 = vrot.lane.b32.xlu0 %v516_v0, %s874_s18 }
  0xa1   : > { %v303_v2 = vpop.permute.xlu1 %302 }
  0xa2   : > { %v301_v5 = vpop.permute.xlu0 %300  ;;  %v307_v14 = vadd.f32 %v303_v2, %v279_v12 }
  0xa3   : > { %534 = vrot.lane.b32.xlu1 %v505_v55, %s875_s21  ;;  %v306_v15 = vadd.f32 %v301_v5, %v278_v13 }
  0xa4   : > { %532 = vrot.lane.b32.xlu0 %v504_v56, %s875_s21 }
  0xa5   : > { %v247_v10 = vpop.permute.xlu1 %246 }
  0xa6   : > { %v245_v11 = vpop.permute.xlu0 %244  ;;  %v251_v44 = vadd.f32 %v247_v10, %v1018_v16 }
  0xa7   : > { %544 = vrot.lane.b32.xlu1 %v1173_v6, %s876_s22  ;;  %v250_v8 = vadd.f32 %v245_v11, %v1021_v17 }
  0xa8   : > { %542 = vrot.lane.b32.xlu0 %v1176_v7, %s876_s22 }
  0xa9   : > { %v331_v24 = vpop.permute.xlu1 %330 }
  0xaa   : > { %v329_v25 = vpop.permute.xlu0 %328  ;;  %v335_v26 = vadd.f32 %v331_v24, %v307_v14 }
  0xab   : > { %v334_v27 = vadd.f32 %v329_v25, %v306_v15 }
  0xac   : > { %v359_v30 = vadd.f32 %v357_v18, %v335_v26 }
  0xad   : > { %v358_v31 = vadd.f32 %v356_v19, %v334_v27  ;;  %v267_v32 = vpop.permute.xlu1 %266 }
  0xae   : > { %v265_v33 = vpop.permute.xlu0 %264  ;;  %v271_v50 = vadd.f32 %v267_v32, %v251_v44 }
  0xaf   : > { %v270_v51 = vadd.f32 %v265_v33, %v250_v8 }
  0xb0   : > { %v323_v61 = vadd.f32 %v1038_v20, %v271_v50 }
  0xb1   : > { %v381_v34 = vpop.permute.xlu1 %380  ;;  %v322_v16 = vadd.f32 %v1041_v21, %v270_v51 }
  0xb2   : > { %v379_v35 = vpop.permute.xlu0 %378  ;;  %v385_v52 = vadd.f32 %v381_v34, %v359_v30 }
  0xb3   : > { %v384_v54 = vadd.f32 %v379_v35, %v358_v31 }
  0xb5   : > { %v351_v38 = vpop.permute.xlu1 %350 }
  0xb6   : > { %v349_v39 = vpop.permute.xlu0 %348  ;;  %v355_v0 = vadd.f32 %v351_v38, %v323_v61 }
  0xb7   : > { %v354_v1 = vadd.f32 %v349_v39, %v322_v16 }
  0xb9   : > { %v399_v42 = vpop.permute.xlu1 %398 }
  0xba   : > { %v397_v43 = vpop.permute.xlu0 %396  ;;  %v403_v55 = vadd.f32 %v399_v42, %v385_v52 }
  0xbb   : > { %v402_v56 = vadd.f32 %v397_v43, %v384_v54 }
  0xbd   : > { %v373_v49 = vpop.permute.xlu1 %372 }
  0xbe   : > { %v371_v9 = vpop.permute.xlu0 %370  ;;  %v377_v10 = vadd.f32 %v373_v49, %v355_v0 }
  0xbf   : > { %v376_v11 = vadd.f32 %v371_v9, %v354_v1 }
  0xc0   : > { %v423_v20 = vadd.f32 %v1064_v28, %v377_v10 }
  0xc1   : > { %v431_v59 = vpop.permute.xlu1 %430  ;;  %v422_v21 = vadd.f32 %v1067_v29, %v376_v11 }
  0xc2   : > { %v429_v60 = vpop.permute.xlu0 %428  ;;  %v435_v63 = vadd.f32 %v431_v59, %v403_v55 }
  0xc3   : > { %v434_v17 = vadd.f32 %v429_v60, %v402_v56 }
  0xc4   : > { %v463_v3 = vadd.f32 %v461_v57, %v435_v63 }
  0xc5   : > { %v462_v4 = vadd.f32 %v460_v58, %v434_v17  ;;  %v455_v2 = vpop.permute.xlu1 %454 }
  0xc6   : > { %v453_v5 = vpop.permute.xlu0 %452  ;;  %v459_v18 = vadd.f32 %v455_v2, %v423_v20 }
  0xc7   : > { %v458_v19 = vadd.f32 %v453_v5, %v422_v21 }
  0xc9   : > { %v483_v12 = vpop.permute.xlu1 %482 }
  0xca   : > { %v481_v13 = vpop.permute.xlu0 %480  ;;  %v487_v14 = vadd.f32 %v483_v12, %v463_v3 }
  0xcb   : > { %v486_v15 = vadd.f32 %v481_v13, %v462_v4 }
  0xcc   : > { %v531_v24 = vadd.f32 %v529_v22, %v487_v14 }
  0xcd   : > { %v530_v25 = vadd.f32 %v528_v23, %v486_v15  ;;  %v475_v26 = vpop.permute.xlu1 %474 }
  0xce   : > { %v473_v27 = vpop.permute.xlu0 %472  ;;  %v479_v30 = vadd.f32 %v475_v26, %v459_v18 }
  0xcf   : > { %v478_v31 = vadd.f32 %v473_v27, %v458_v19 }
  0xd0   : > { %557 = vrot.lane.b32.xlu1 %v479_v30, %s872_s14 }
  0xd1   : > { %555 = vrot.lane.b32.xlu0 %v478_v31, %s872_s14  ;;  %v169_v47 = vpop.permute.xlu1 %168  ;;  %s877_s14 = smov [#allocation2]  }
  0xd2   : > { %v167_v48 = vpop.permute.xlu0 %166  ;;  %v173_v38 = vadd.f32 %v169_v47, %v1162_v62  ;;  %s779_s15 = sshll.u32 %s877_s14, 4  ;;  %s780_s15 = int_to_ptr.vmem [resolvable:$false] %s779_s15 }
  0xd3   : > { %v172_v39 = vadd.f32 %v167_v48, %v1152_v53  ;;  %p782_p4 = scmp.lt.s32.totalorder %s1222_s30, %s780_s15 }
  0xd4   : > { %568 = vrot.lane.b32.xlu1 %v531_v24, %s874_s18 }
  0xd5   : > { %566 = vrot.lane.b32.xlu0 %v530_v25, %s874_s18  ;;  %v181_v28 = vpop.permute.xlu1 %180  ;;  %s781_s18 = scalar_lea.vmem %s780_s15, 1536 }
  0xd6   : > { %v179_v29 = vpop.permute.xlu0 %178  ;;  %v185_v42 = vadd.f32 %v181_v28, %v173_v38  ;;  %p783_p5 = scmp.lt.s32.totalorder %s781_s18, %s775_s10 }
  0xd7   : > { %v184_v43 = vadd.f32 %v179_v29, %v172_v39 }
  0xd8   : > { %p784_p6 = por %p783_p5, %p782_p4 }
  0xd9   : > { %v191_v32 = vpop.permute.xlu1 %190 }
  0xda   : > { %v189_v33 = vpop.permute.xlu0 %188  ;;  %v195_v49 = vadd.f32 %v191_v32, %v185_v42  ;;  %p785_p7 = pnand %p784_p6, %p778_p2 }
  0xdb   : > { %v194_v9 = vadd.f32 %v189_v33, %v184_v43 }
  0xdc   : > { %v201_v52 = vadd.f32 %v1097_v36, %v195_v49 }
  0xdd   : > { %v209_v34 = vpop.permute.xlu1 %208  ;;  %v200_v54 = vadd.f32 %v1100_v37, %v194_v9 }
  0xde   : > { %v207_v35 = vpop.permute.xlu0 %206  ;;  %v213_v57 = vadd.f32 %v209_v34, %v201_v52 }
  0xdf   : > { %v212_v58 = vadd.f32 %v207_v35, %v200_v54 }
  0xe1   : > { %v235_v44 = vpop.permute.xlu1 %234 }
  0xe2   : > { %v233_v8 = vpop.permute.xlu0 %232  ;;  %v239_v59 = vadd.f32 %v235_v44, %v213_v57 }
  0xe3   : > { %v238_v62 = vadd.f32 %v233_v8, %v212_v58 }
  0xe5   : > { %v259_v50 = vpop.permute.xlu1 %258 }
  0xe6   : > { %v257_v51 = vpop.permute.xlu0 %256  ;;  %v263_v61 = vadd.f32 %v259_v50, %v239_v59 }
  0xe7   : > { %v262_v16 = vadd.f32 %v257_v51, %v238_v62 }
  0xe9   : > { %v285_v55 = vpop.permute.xlu1 %284 }
  0xea   : > { %v283_v56 = vpop.permute.xlu0 %282  ;;  %v289_v63 = vadd.f32 %v285_v55, %v263_v61 }
  0xeb   : > { %v288_v17 = vadd.f32 %v283_v56, %v262_v16 }
  0xec   : > { %v295_v3 = vadd.f32 %v1117_v40, %v289_v63 }
  0xed   : > { %v315_v60 = vpop.permute.xlu1 %314  ;;  %v294_v36 = vadd.f32 %v1120_v41, %v288_v17 }
  0xee   : > { %v313_v53 = vpop.permute.xlu0 %312  ;;  %v319_v2 = vadd.f32 %v315_v60, %v295_v3 }
  0xef   : > { %v318_v5 = vadd.f32 %v313_v53, %v294_v36 }
  0xf1   : > { %v339_v0 = vpop.permute.xlu1 %338 }
  0xf2   : > { %v337_v1 = vpop.permute.xlu0 %336  ;;  %v343_v22 = vadd.f32 %v339_v0, %v319_v2 }
  0xf3   : > { %v342_v23 = vadd.f32 %v337_v1, %v318_v5 }
  0xf5   : > { %v363_v4 = vpop.permute.xlu1 %362 }
  0xf6   : > { %v361_v37 = vpop.permute.xlu0 %360  ;;  %v367_v12 = vadd.f32 %v363_v4, %v343_v22 }
  0xf7   : > { %v366_v13 = vadd.f32 %v361_v37, %v342_v23 }
  0xf9   : > { %v391_v10 = vpop.permute.xlu1 %390 }
  0xfa   : > { %v389_v11 = vpop.permute.xlu0 %388  ;;  %v395_v14 = vadd.f32 %v391_v10, %v367_v12 }
  0xfb   : > { %v394_v15 = vadd.f32 %v389_v11, %v366_v13 }
  0xfc   : > { %v409_v40 = vadd.f32 %v1140_v45, %v395_v14 }
  0xfd   : > { %v417_v20 = vpop.permute.xlu1 %416  ;;  %v408_v41 = vadd.f32 %v1143_v46, %v394_v15 }
  0xfe   : > { %v415_v21 = vpop.permute.xlu0 %414  ;;  %v421_v26 = vadd.f32 %v417_v20, %v409_v40 }
  0xff   : > { %v420_v27 = vadd.f32 %v415_v21, %v408_v41 }
 0x101   : > { %v443_v18 = vpop.permute.xlu1 %442 }
 0x102   : > { %v441_v19 = vpop.permute.xlu0 %440  ;;  %v447_v30 = vadd.f32 %v443_v18, %v421_v26 }
 0x103   : > { %v446_v31 = vadd.f32 %v441_v19, %v420_v27 }
 0x105   : > { %v467_v24 = vpop.permute.xlu1 %466 }
 0x106   : > { %v465_v25 = vpop.permute.xlu0 %464  ;;  %v471_v28 = vadd.f32 %v467_v24, %v447_v30 }
 0x107   : > { %v470_v29 = vadd.f32 %v465_v25, %v446_v31 }
 0x109   : > { %v493_v47 = vpop.permute.xlu1 %492 }
 0x10a   : > { %v491_v48 = vpop.permute.xlu0 %490  ;;  %v497_v32 = vadd.f32 %v493_v47, %v471_v28 }
 0x10b   : > { %v496_v33 = vadd.f32 %v491_v48, %v470_v29 }
 0x10c   : > { %v503_v45 = vadd.f32 %v1173_v6, %v497_v32 }
 0x10d   : > { %v511_v34 = vpop.permute.xlu1 %510  ;;  %v502_v46 = vadd.f32 %v1176_v7, %v496_v33 }
 0x10e   : > { %v509_v35 = vpop.permute.xlu0 %508  ;;  %v515_v42 = vadd.f32 %v511_v34, %v503_v45 }
 0x10f   : > { %v514_v43 = vadd.f32 %v509_v35, %v502_v46 }
 0x111   : > { %v523_v38 = vpop.permute.xlu1 %522 }
 0x112   : > { %v521_v39 = vpop.permute.xlu0 %520  ;;  %v527_v49 = vadd.f32 %v523_v38, %v515_v42 }
 0x113   : > { %v526_v9 = vadd.f32 %v521_v39, %v514_v43 }
 0x115   : > { %v535_v44 = vpop.permute.xlu1 %534 }
 0x116   : > { %v533_v8 = vpop.permute.xlu0 %532  ;;  %v539_v50 = vadd.f32 %v535_v44, %v527_v49 }
 0x117   : > { %v538_v51 = vadd.f32 %v533_v8, %v526_v9 }
 0x119   : > { %v545_v52 = vpop.permute.xlu1 %544 }
 0x11a   : > { %v543_v6 = vpop.permute.xlu0 %542  ;;  %v549_v54 = vadd.f32 %v545_v52, %v539_v50 }
 0x11b   : > { %v548_v7 = vadd.f32 %v543_v6, %v538_v51 }
 0x11c   : > { %552 = vst.msk [vmem:[%s133_s26 + $0x8] sm:$0xff] %vm550_vm0, %v549_v54 }
 0x11d   : > { %551 = vst.msk [vmem:[%s133_s26] sm:$0xff] %vm550_vm0, %v548_v7 }
 0x142   : > { %v558_v55 = vpop.permute.xlu1 %557 }
 0x143   : > { %v556_v56 = vpop.permute.xlu0 %555  ;;  %684 = vst.msk [vmem:[%s133_s26 + $0x18] sm:$0xff] %vm550_vm0, %v558_v55 }
 0x144   : > { %683 = vst.msk [vmem:[%s133_s26 + $0x10] sm:$0xff] %vm550_vm0, %v556_v56 }
 0x146   : > { %v569_v57 = vpop.permute.xlu1 %568 }
 0x147   : > { %v567_v58 = vpop.permute.xlu0 %566  ;;  %686 = vst.msk [vmem:[%s133_s26 + $0x28] sm:$0xff] %vm550_vm0, %v569_v57 }
 0x148   : > { %685 = vst.msk [vmem:[%s133_s26 + $0x20] sm:$0xff] %vm550_vm0, %v567_v58 }
 0x149   : > { %788 = shalt.err (!%p785_p7)
}
 0x14a   : > { %s789_s21 = scalar_lea.hbm %s1220_s5, 768  ;;  %s793_s25 = scalar_lea.hbm %s1281_s1, 4608 }
 0x14b   : > { %p790_p9 = scmp.ne.s32.totalorder %s1220_s5, %s789_s21  ;;  %p794_p12 = scmp.lt.u32.totalorder %s1220_s5, %s1281_s1 }
 0x14c   : > { %p795_p13 = scmp.lt.u32.totalorder %s793_s25, %s789_s21  ;;  %p797_p1 = scmp.lt.u32.totalorder %s789_s21, %s1220_s5 }
 0x14d   : > { %p791_p10 = pnand %p790_p9, %p941_p3 }
 0x14e   : > { %p796_p0 = por %p795_p13, %p794_p12 }
 0x14f   : > { %p792_p11 = pneg %p791_p10 }
 0x150   : > { %p798_p2 = por %p797_p1, %p796_p0 }
 0x152   : > { %p799_p4 = pnand %p798_p2, %p792_p11 }
 0x154   : > { %802 = shalt.err (!%p799_p4)
}
 0x155   : > { %s878_s28 = smov 128   ;;  %s879_s29 = smov 8  }
 0x156   : > { %696 = dma.vmem_to_hbm [thread:$0]  (%p941_p3), %s1222_s30, 768, %s1220_s5, %s1228_s9, %s878_s28, %s878_s28, %s879_s29  }
 0x157 PF: > { %p702_p5 = scmp.ge.s32.totalorder %s869_s13, 2  ;;  %s607_s2 = sand.u32 1, %s841_s6  }
 0x158   : > { %s608_s3 = scalar_lea.sflag [#allocation3], %s607_s2 }
 0x159   : > { %p699_p6 = pnand %p702_p5, %p950_p8 }
 0x15b   : > { %836 = dma.done.wait (!%p699_p6), %s608_s3, 768  }
 0x15c   : > { %838 = vsyncadd (!%p699_p6), %s608_s3, 4294966528  ;;  %s14_s13 = sadd.s32 1, %s869_s13   ;;  %s1284_s6 = smov %s845_s7 }
 0x15d   : > { %p11_p7 = scmp.ge.s32.totalorder %s14_s13, 8   ;;  %s1285_s7 = smov %s849_s8 }
 0x15e   : > { %s1286_s8 = smov %s959_s24  ;;  %s1287_s9 = smov %s861_s11 }
 0x15f   : > { %s1288_s10 = smov %s865_s12  ;;  %s1289_s11 = smov %s1292_s16 }
 0x160   : > { %s1290_s12 = smov %s1296_s17  ;;  %13 = sbr.rel (!%p11_p7) target bundleno = 5 (0x5), region = 61 }
 0x167   :  { %613 = vsyncpa [#allocation3], 1 }
 0x168   :  { %615 = vsyncpa [#allocation3 + $0x1], 1 }

</bundles_post_ra>
